<compile_context>
chip_gen: v5e
topology: v5e:2x2
jax: 0.10.0
libtpu: 0.0.40
codegen_flags: <defaults>
</compile_context>

<pallas_src>
import functools

import jax
import jax.numpy as jnp
from jax.experimental import pallas as pl
from jax.experimental.pallas import tpu as pltpu

_LANES = 128
_SUBLANES = 8


def _largest_divisor_le(n, cap):
    """Largest divisor of n that is <= cap (>= 1)."""
    cap = max(1, min(n, cap))
    for d in range(cap, 0, -1):
        if n % d == 0:
            return d
    return 1


def _dice_sums_kernel(x_ref, t_ref, inter_ref, denom_ref, *,
                      rows_total, tile_rows, n_groups, chunks_per_group, slab_rows):
    """Accumulate per-sample partial sums of x*t and x+t into lane-dense slabs."""
    g = pl.program_id(1)  # chunk-group (parallel)
    k = pl.program_id(2)  # chunk within group (sequential / "arbitrary")

    @pl.when(k == 0)
    def _():
        inter_ref[...] = jnp.zeros_like(inter_ref)
        denom_ref[...] = jnp.zeros_like(denom_ref)

    x = x_ref[...].astype(jnp.float32)  # (bn, tile_rows, 128)
    t = t_ref[...].astype(jnp.float32)
    prod = x * t
    both = x + t  # sum(x) + sum(t) fused into a single accumulator

    bn = x_ref.shape[0]

    def accumulate(p, s):
        if slab_rows == _SUBLANES:
            # Fold (bn, tile_rows, 128) down to (bn, 8, 128) with pure vreg adds.
            inter_ref[...] += jnp.sum(
                p.reshape(bn, tile_rows // _SUBLANES, _SUBLANES, _LANES), axis=1)
            denom_ref[...] += jnp.sum(
                s.reshape(bn, tile_rows // _SUBLANES, _SUBLANES, _LANES), axis=1)
        else:
            # tile_rows not a multiple of 8 (small / odd R): single XLU reduce.
            inter_ref[...] += jnp.sum(p, axis=1, keepdims=True)
            denom_ref[...] += jnp.sum(s, axis=1, keepdims=True)

    n_chunks = n_groups * chunks_per_group
    last_rows = rows_total - (n_chunks - 1) * tile_rows  # rows in the final chunk

    if last_rows == tile_rows:
        # R divides evenly into chunks: no masking anywhere.
        accumulate(prod, both)
    else:
        # Only the very last chunk reads out-of-bounds rows (unspecified VMEM
        # contents); mask it there and nowhere else.
        is_last = jnp.logical_and(g == n_groups - 1, k == chunks_per_group - 1)

        @pl.when(is_last)
        def _():
            row = jax.lax.broadcasted_iota(jnp.int32, prod.shape, 1)
            keep = row < last_rows
            accumulate(jnp.where(keep, prod, 0.0), jnp.where(keep, both, 0.0))

        @pl.when(jnp.logical_not(is_last))
        def _():
            accumulate(prod, both)


def dice_loss(inputs, targets, *, target_block_bytes=4 << 20):
    """Dice loss matching the PyTorch reference (smooth = 1e-5)."""
    smooth = 1e-05
    n = inputs.shape[0]
    x = inputs.reshape(n, -1)
    t = targets.reshape(n, -1)
    d = x.shape[1]

    # Only pad when D is not already a multiple of 128 lanes; the mod-1024
    # remainder is handled in-kernel by masking the last chunk.
    pad = (-d) % _LANES
    if pad:
        # TODO(synk): lane-mask a flat (N, D) layout to avoid this extra HBM
        # pass when C*H*W is not a multiple of 128 (zeros don't perturb sums).
        x = jnp.pad(x, ((0, 0), (0, pad)))
        t = jnp.pad(t, ((0, 0), (0, pad)))
    r = x.shape[1] // _LANES
    x = x.reshape(n, r, _LANES)  # row-major view, no HBM copy
    t = t.reshape(n, r, _LANES)

    item_x = jnp.dtype(x.dtype).itemsize
    item_t = jnp.dtype(t.dtype).itemsize
    max_item = max(item_x, item_t)
    # Minimum sublane tile (packing): f32 -> 8 rows, bf16 -> 16, int8/fp8 -> 32.
    pack = 32 // min(item_x, item_t)
    target_rows = max(pack, (target_block_bytes // (_LANES * max_item)) // pack * pack)

    if r <= target_rows:
        # Whole sample fits in one chunk; amortize per-step overhead across
        # several samples per block (bn), block stays ~target_block_bytes.
        tile_rows = r
        n_chunks = 1
        per_sample = r * _LANES * max_item
        bn = _largest_divisor_le(n, max(1, target_block_bytes // max(per_sample, 1)))
    else:
        tile_rows = target_rows  # multiple of `pack` (and of 8)
        n_chunks = pl.cdiv(r, tile_rows)
        bn = 1

    slab_rows = _SUBLANES if tile_rows % _SUBLANES == 0 else 1
    n_sample_blocks = n // bn

    # v7x megacore coverage: when the parallel sample axis has odd extent and
    # the chunk axis splits evenly, run two parallel chunk-groups with their own
    # accumulator slabs.  Single-TC generations are unaffected.
    if n_sample_blocks % 2 == 1 and n_chunks >= 2 and n_chunks % 2 == 0:
        n_groups = 2
    else:
        n_groups = 1
    cpg = n_chunks // n_groups

    kernel = functools.partial(
        _dice_sums_kernel,
        rows_total=r, tile_rows=tile_rows,
        n_groups=n_groups, chunks_per_group=cpg, slab_rows=slab_rows)

    bytes_accessed = n * r * _LANES * (item_x + item_t) \
        + 2 * n * n_groups * slab_rows * _LANES * 4
    cost = pl.CostEstimate(flops=4 * n * r * _LANES, transcendentals=0,
                           bytes_accessed=int(bytes_accessed))

    inter_blk, denom_blk = pl.pallas_call(
        kernel,
        out_shape=(
            jax.ShapeDtypeStruct((n, n_groups, slab_rows, _LANES), jnp.float32),
            jax.ShapeDtypeStruct((n, n_groups, slab_rows, _LANES), jnp.float32),
        ),
        grid_spec=pltpu.PrefetchScalarGridSpec(
            num_scalar_prefetch=0,
            grid=(n_sample_blocks, n_groups, cpg),
            in_specs=[
                pl.BlockSpec((bn, tile_rows, _LANES), lambda i, g, k: (i, g * cpg + k, 0)),
                pl.BlockSpec((bn, tile_rows, _LANES), lambda i, g, k: (i, g * cpg + k, 0)),
            ],
            out_specs=[
                pl.BlockSpec((bn, None, slab_rows, _LANES), lambda i, g, k: (i, g, 0, 0)),
                pl.BlockSpec((bn, None, slab_rows, _LANES), lambda i, g, k: (i, g, 0, 0)),
            ],
        ),
        compiler_params=pltpu.CompilerParams(
            dimension_semantics=("parallel", "parallel", "arbitrary"),
            # 2 inputs x 2 pipeline buffers x 4 MiB blocks = 16 MiB, which would
            # hit v5e's 16 MiB default scoped-VMEM limit; 32 MiB is safe on all
            # generations (v7x physical VMEM is 64 MiB).
            vmem_limit_bytes=32 << 20,
        ),
        cost_estimate=cost,
    )(x, t)

    # Tiny final cross-lane reduction + dice + mean outside the kernel.
    inter = jnp.sum(inter_blk, axis=(1, 2, 3))   # (N,)
    denom = jnp.sum(denom_blk, axis=(1, 2, 3))   # (N,)
    dice = (2.0 * inter + smooth) / (denom + smooth)
    return 1.0 - jnp.sum(dice) / n


def dice_loss_ref(inputs, targets):
    smooth = 1e-05
    n = inputs.shape[0]
    x = inputs.reshape(n, -1).astype(jnp.float32)
    t = targets.reshape(n, -1).astype(jnp.float32)
    inter = jnp.sum(x * t, axis=1)
    dice = (2.0 * inter + smooth) / (jnp.sum(x, axis=1) + jnp.sum(t, axis=1) + smooth)
    return 1.0 - jnp.sum(dice) / n


if __name__ == "__main__":
    key = jax.random.PRNGKey(0)
    k1, k2 = jax.random.split(key)
    # NCHW, as a segmentation head would produce: batch=2, channels=4, 16x16
    inputs = jax.nn.sigmoid(jax.random.normal(k1, (2, 4, 16, 16), dtype=jnp.float32))
    targets = (jax.random.uniform(k2, (2, 4, 16, 16)) > 0.5).astype(jnp.float32)

    out = jax.block_until_ready(dice_loss(inputs, targets))
    ref = jax.block_until_ready(dice_loss_ref(inputs, targets))
    assert jnp.allclose(out, ref, atol=1e-5, rtol=1e-5), (out, ref)
    print("KERNEL_OK")
</pallas_src>

<mosaic_0001>
module attributes {stable_mosaic.version = 11 : i64} {
  func.func @_dice_sums_kernel(%arg0: i32, %arg1: i32, %arg2: i32, %arg3: memref<2x8x128xf32, #tpu.memory_space<vmem>>, %arg4: memref<2x8x128xf32, #tpu.memory_space<vmem>>, %arg5: memref<2x1x8x128xf32, #tpu.memory_space<vmem>>, %arg6: memref<2x1x8x128xf32, #tpu.memory_space<vmem>>) attributes {dimension_semantics = [#tpu.dimension_semantics<parallel>, #tpu.dimension_semantics<parallel>, #tpu.dimension_semantics<arbitrary>], iteration_bounds = array<i64: 1, 1, 1>, scalar_prefetch = 0 : i64, scratch_operands = 0 : i64, tpu.core_type = #tpu.core_type<tc>, window_params = [{transform_indices = @transform_0, window_bounds = array<i64: 2, 8, 128>}, {transform_indices = @transform_1, window_bounds = array<i64: 2, 8, 128>}, {transform_indices = @transform_2, window_bounds = array<i64: 2, 1, 8, 128>}, {transform_indices = @transform_3, window_bounds = array<i64: 2, 1, 8, 128>}]} {
    %c0_i32 = arith.constant 0 : i32
    %0 = arith.cmpi eq, %arg2, %c0_i32 : i32
    %1 = arith.extui %0 : i1 to i32
    %c0_i32_0 = arith.constant 0 : i32
    %2 = arith.cmpi ne, %1, %c0_i32_0 : i32
    scf.if %2 {
      %cst_23 = arith.constant 0.000000e+00 : f32
      %23 = vector.broadcast %cst_23 : f32 to vector<2x8x128xf32>
      %c0_24 = arith.constant 0 : index
      %c0_25 = arith.constant 0 : index
      %c0_26 = arith.constant 0 : index
      %c0_27 = arith.constant 0 : index
      %24 = vector.load %arg5[%c0_24, %c0_25, %c0_26, %c0_27] : memref<2x1x8x128xf32, #tpu.memory_space<vmem>>, vector<2x1x8x128xf32>
      %25 = vector.shape_cast %24 : vector<2x1x8x128xf32> to vector<2x8x128xf32>
      %26 = vector.shape_cast %23 : vector<2x8x128xf32> to vector<2x1x8x128xf32>
      tpu.vector_store %arg5[%c0_24, %c0_25, %c0_26, %c0_27], %26 {strides = array<i32>} : memref<2x1x8x128xf32, #tpu.memory_space<vmem>>, vector<2x1x8x128xf32>,
      %cst_28 = arith.constant 0.000000e+00 : f32
      %27 = vector.broadcast %cst_28 : f32 to vector<2x8x128xf32>
      %c0_29 = arith.constant 0 : index
      %c0_30 = arith.constant 0 : index
      %c0_31 = arith.constant 0 : index
      %c0_32 = arith.constant 0 : index
      %28 = vector.load %arg6[%c0_29, %c0_30, %c0_31, %c0_32] : memref<2x1x8x128xf32, #tpu.memory_space<vmem>>, vector<2x1x8x128xf32>
      %29 = vector.shape_cast %28 : vector<2x1x8x128xf32> to vector<2x8x128xf32>
      %30 = vector.shape_cast %27 : vector<2x8x128xf32> to vector<2x1x8x128xf32>
      tpu.vector_store %arg6[%c0_29, %c0_30, %c0_31, %c0_32], %30 {strides = array<i32>} : memref<2x1x8x128xf32, #tpu.memory_space<vmem>>, vector<2x1x8x128xf32>,
    } else {
    }
    %c0 = arith.constant 0 : index
    %c0_1 = arith.constant 0 : index
    %c0_2 = arith.constant 0 : index
    %3 = vector.load %arg3[%c0, %c0_1, %c0_2] : memref<2x8x128xf32, #tpu.memory_space<vmem>>, vector<2x8x128xf32>
    %c0_3 = arith.constant 0 : index
    %c0_4 = arith.constant 0 : index
    %c0_5 = arith.constant 0 : index
    %4 = vector.load %arg4[%c0_3, %c0_4, %c0_5] : memref<2x8x128xf32, #tpu.memory_space<vmem>>, vector<2x8x128xf32>
    %5 = arith.mulf %3, %4 : vector<2x8x128xf32>
    %6 = arith.addf %3, %4 : vector<2x8x128xf32>
    %c0_6 = arith.constant 0 : index
    %c0_7 = arith.constant 0 : index
    %c0_8 = arith.constant 0 : index
    %c0_9 = arith.constant 0 : index
    %7 = vector.load %arg5[%c0_6, %c0_7, %c0_8, %c0_9] : memref<2x1x8x128xf32, #tpu.memory_space<vmem>>, vector<2x1x8x128xf32>
    %8 = vector.shape_cast %7 : vector<2x1x8x128xf32> to vector<2x8x128xf32>
    %9 = vector.shape_cast %5 : vector<2x8x128xf32> to vector<2x1x8x128xf32>
    %cst = arith.constant dense<0.000000e+00> : vector<2x8x128xf32>
    %10 = vector.multi_reduction <add>, %9, %cst [1] : vector<2x1x8x128xf32> to vector<2x8x128xf32>
    %11 = arith.addf %8, %10 : vector<2x8x128xf32>
    %c0_10 = arith.constant 0 : index
    %c0_11 = arith.constant 0 : index
    %c0_12 = arith.constant 0 : index
    %c0_13 = arith.constant 0 : index
    %12 = vector.load %arg5[%c0_10, %c0_11, %c0_12, %c0_13] : memref<2x1x8x128xf32, #tpu.memory_space<vmem>>, vector<2x1x8x128xf32>
    %13 = vector.shape_cast %12 : vector<2x1x8x128xf32> to vector<2x8x128xf32>
    %14 = vector.shape_cast %11 : vector<2x8x128xf32> to vector<2x1x8x128xf32>
    tpu.vector_store %arg5[%c0_10, %c0_11, %c0_12, %c0_13], %14 {strides = array<i32>} : memref<2x1x8x128xf32, #tpu.memory_space<vmem>>, vector<2x1x8x128xf32>,
    %c0_14 = arith.constant 0 : index
    %c0_15 = arith.constant 0 : index
    %c0_16 = arith.constant 0 : index
    %c0_17 = arith.constant 0 : index
    %15 = vector.load %arg6[%c0_14, %c0_15, %c0_16, %c0_17] : memref<2x1x8x128xf32, #tpu.memory_space<vmem>>, vector<2x1x8x128xf32>
    %16 = vector.shape_cast %15 : vector<2x1x8x128xf32> to vector<2x8x128xf32>
    %17 = vector.shape_cast %6 : vector<2x8x128xf32> to vector<2x1x8x128xf32>
    %cst_18 = arith.constant dense<0.000000e+00> : vector<2x8x128xf32>
    %18 = vector.multi_reduction <add>, %17, %cst_18 [1] : vector<2x1x8x128xf32> to vector<2x8x128xf32>
    %19 = arith.addf %16, %18 : vector<2x8x128xf32>
    %c0_19 = arith.constant 0 : index
    %c0_20 = arith.constant 0 : index
    %c0_21 = arith.constant 0 : index
    %c0_22 = arith.constant 0 : index
    %20 = vector.load %arg6[%c0_19, %c0_20, %c0_21, %c0_22] : memref<2x1x8x128xf32, #tpu.memory_space<vmem>>, vector<2x1x8x128xf32>
    %21 = vector.shape_cast %20 : vector<2x1x8x128xf32> to vector<2x8x128xf32>
    %22 = vector.shape_cast %19 : vector<2x8x128xf32> to vector<2x1x8x128xf32>
    tpu.vector_store %arg6[%c0_19, %c0_20, %c0_21, %c0_22], %22 {strides = array<i32>} : memref<2x1x8x128xf32, #tpu.memory_space<vmem>>, vector<2x1x8x128xf32>,
    return
  }
  func.func @transform_0(%arg0: i32, %arg1: i32, %arg2: i32) -> (i32, i32, i32) {
    %c1_i32 = arith.constant 1 : i32
    %0 = arith.muli %arg1, %c1_i32 : i32
    %1 = arith.addi %0, %arg2 : i32
    %c0_i32 = arith.constant 0 : i32
    %c0_i32_0 = arith.constant 0 : i32
    return %arg0, %1, %c0_i32 : i32, i32, i32
  }
  func.func @transform_1(%arg0: i32, %arg1: i32, %arg2: i32) -> (i32, i32, i32) {
    %c1_i32 = arith.constant 1 : i32
    %0 = arith.muli %arg1, %c1_i32 : i32
    %1 = arith.addi %0, %arg2 : i32
    %c0_i32 = arith.constant 0 : i32
    %c0_i32_0 = arith.constant 0 : i32
    return %arg0, %1, %c0_i32 : i32, i32, i32
  }
  func.func @transform_2(%arg0: i32, %arg1: i32, %arg2: i32) -> (i32, i32, i32, i32) {
    %c0_i32 = arith.constant 0 : i32
    %c0_i32_0 = arith.constant 0 : i32
    %c0_i32_1 = arith.constant 0 : i32
    return %arg0, %arg1, %c0_i32, %c0_i32_0 : i32, i32, i32, i32
  }
  func.func @transform_3(%arg0: i32, %arg1: i32, %arg2: i32) -> (i32, i32, i32, i32) {
    %c0_i32 = arith.constant 0 : i32
    %c0_i32_0 = arith.constant 0 : i32
    %c0_i32_1 = arith.constant 0 : i32
    return %arg0, %arg1, %c0_i32, %c0_i32_0 : i32, i32, i32, i32
  }
}

</mosaic_0001>

<bundles_post_ra>
// kernel: tpu_custom_call.1
= control target key start
LH: loop header
LB: loop body
LE: loop exit
PB: predicated region body
PF: predicated region fallthrough
CT: control target
= control target key end

     0   :  { %9 = vsyncpa [#allocation3], 0  ;;  %s286_s0 = inlined_call_operand.hbm [shape: f32[2,8,128], index: 0, kind: input, shape index: {}]   ;;  %s287_s1 = inlined_call_operand.hbm [shape: f32[2,8,128], index: 1, kind: input, shape index: {}]   ;;  %s288_s2 = inlined_call_operand.hbm [shape: f32[2,1,8,128], index: 2, kind: output, shape index: {0}]   ;;  %s289_s3 = inlined_call_operand.hbm [shape: f32[2,1,8,128], index: 3, kind: output, shape index: {1}]  }
   0x1   :  { %10 = vsyncpa [#allocation6], 0 }
   0x2   :  { %11 = vsyncpa [#allocation4], 0 }
   0x3   :  { %12 = vsyncpa [#allocation9], 0  ;;  %s20_s14 = sshll.u32 %s286_s0, 4  ;;  %s236_s15 = smov [#allocation2]   ;;  %s21_s14 = int_to_ptr.hbm [resolvable:$true] %s20_s14 }
   0x4   :  { %s22_s16 = sshll.u32 %s236_s15, 4  ;;  %s36_s19 = sshll.u32 %s287_s1, 4  ;;  %s23_s16 = int_to_ptr.vmem [resolvable:$true] %s22_s16  ;;  %s37_s19 = int_to_ptr.hbm [resolvable:$true] %s36_s19 }
   0x5   :  { %s237_s20 = smov 128   ;;  %s238_s21 = smov 8  }
   0x6   :  { %28 = dma.hbm_to_vmem [thread:$0]  %s21_s14, 256, %s23_s16, [#allocation3], %s237_s20, %s237_s20, %s238_s21  }
   0x7   :  { %s239_s22 = smov [#allocation5]  }
   0x8   :  { %s38_s23 = sshll.u32 %s239_s22, 4  ;;  %s39_s23 = int_to_ptr.vmem [resolvable:$true] %s38_s23 }
   0x9   :  { %44 = dma.hbm_to_vmem [thread:$0]  %s37_s19, 256, %s39_s23, [#allocation6], %s237_s20, %s237_s20, %s238_s21  }
   0xa   :  { %228 = dma.done.wait [#allocation3], 256  }
   0xb   :  { %229 = vsyncadd [#allocation3], 4294967040 }
   0xc   :  { %230 = dma.done.wait [#allocation6], 256  }
   0xd   :  { %231 = vsyncadd [#allocation6], 4294967040  ;;  %v63_v0 = vld [vmem:[#allocation2] sm:$0xff]  ;;  %v65_v1 = vld [vmem:[#allocation5] sm:$0xff]  ;;  %s240_s0 = smov [#allocation7]   ;;  %s93_s26 = sshll.u32 %s288_s2, 4  ;;  %s94_s26 = int_to_ptr.hbm [resolvable:$true] %s93_s26 }
   0xe   :  { %v64_v2 = vld [vmem:[#allocation2 + $0x8] sm:$0xff]  ;;  %v67_v3 = vmul.f32 %v65_v1, %v63_v0  ;;  %v66_v4 = vld [vmem:[#allocation5 + $0x8] sm:$0xff]  ;;  %v69_v5 = vadd.f32 %v65_v1, %v63_v0  ;;  %s91_s1 = sshll.u32 %s240_s0, 4  ;;  %s241_s27 = smov [#allocation8]   ;;  %s92_s1 = int_to_ptr.vmem [resolvable:$true] %s91_s1 }
   0xf   :  { %v68_v6 = vmul.f32 %v66_v4, %v64_v2  ;;  %v70_v7 = vadd.f32 %v66_v4, %v64_v2  ;;  %s104_s28 = sshll.u32 %s241_s27, 4  ;;  %s106_s4 = sshll.u32 %s289_s3, 4  ;;  %s105_s28 = int_to_ptr.vmem [resolvable:$true] %s104_s28  ;;  %s107_s4 = int_to_ptr.hbm [resolvable:$true] %s106_s4 }
  0x10   :  { %77 = vst [vmem:[#allocation7] sm:$0xff] %v67_v3 }
  0x11   :  { %78 = vst [vmem:[#allocation7 + $0x8] sm:$0xff] %v68_v6 }
  0x12   :  { %85 = vst [vmem:[#allocation8] sm:$0xff] %v69_v5  ;;  %99 = dma.vmem_to_hbm [thread:$0]  %s92_s1, 256, %s94_s26, [#allocation4], %s237_s20, %s237_s20, %s238_s21  }
  0x13   :  { %86 = vst [vmem:[#allocation8 + $0x8] sm:$0xff] %v70_v7 }
  0x14   :  { %112 = dma.vmem_to_hbm [thread:$0]  %s105_s28, 256, %s107_s4, [#allocation9], %s237_s20, %s237_s20, %s238_s21  }
  0x15   :  { %232 = dma.done.wait [#allocation4], 256  }
  0x16   :  { %233 = vsyncadd [#allocation4], 4294967040 }
  0x17   :  { %234 = dma.done.wait [#allocation9], 256  }
  0x18   :  { %235 = vsyncadd [#allocation9], 4294967040 }
  0x19   :  { %121 = vsyncpa [#allocation3], 1 }
  0x1a   :  { %122 = vsyncpa [#allocation6], 1 }
  0x1b   :  { %123 = vsyncpa [#allocation4], 1 }
  0x1c   :  { %124 = vsyncpa [#allocation9], 1 }

</bundles_post_ra>
